<compile_context>
chip_gen: v7x
topology: tpu7x:2x2x1
jax: 0.10.0
libtpu: 0.0.40
codegen_flags: <defaults>
</compile_context>

<pallas_src>
import functools

import jax
import jax.numpy as jnp
from jax.experimental import pallas as pl
from jax.experimental.pallas import tpu as pltpu

LN_EPS = 1e-5


def diff_kernel(x1_ref, x2_ref, w1t_ref, b1_ref, w2t_ref, b2_ref, o_ref,
                *, gelu_bf16):
    # (C, T) tile straight out of NCHW memory: channels on sublanes, pixels on lanes.
    d = jnp.abs(x1_ref[0].astype(jnp.float32) - x2_ref[0].astype(jnp.float32))  # (C, T)

    # LayerNorm over the channel (sublane) axis, single fused pass:
    #   mean = E[d], var = max(E[d^2] - mean^2, 0)   (clamped before +eps).
    inv_c = 1.0 / d.shape[0]
    mean = jnp.sum(d, axis=0, keepdims=True) * inv_c          # (1, T)
    ex2 = jnp.sum(d * d, axis=0, keepdims=True) * inv_c       # (1, T)
    var = jnp.maximum(ex2 - mean * mean, 0.0)
    dn = (d - mean) * jax.lax.rsqrt(var + LN_EPS)              # (C, T)
    # gamma/beta are folded into w1t/b1 by the wrapper (exact rewrite).

    # FeedForward as transposed 1x1 convs: (4C,C)@(C,T) -> GELU -> (C,4C)@(4C,T).
    # bf16 MXU operands, f32 accumulation.
    h = jnp.dot(w1t_ref[...], dn.astype(jnp.bfloat16),
                preferred_element_type=jnp.float32) + b1_ref[...]
    if gelu_bf16:
        # v6e/v7x: bf16 VALU/EUP -> run the GELU elementwise math packed 2/lane.
        h = jax.nn.gelu(h.astype(jnp.bfloat16), approximate=True)
    else:
        # v5e: no bf16 VPU/EUP path -> keep GELU in f32, cast only for the MXU.
        h = jax.nn.gelu(h, approximate=True).astype(jnp.bfloat16)
    ffn = jnp.dot(w2t_ref[...], h, preferred_element_type=jnp.float32) + b2_ref[...]

    # Residual: un-normalized abs-diff + FFN output.  Lane-dense store.
    o_ref[0] = (d + ffn).astype(o_ref.dtype)


def _round_up(x, m):
    return ((x + m - 1) // m) * m


def _choose_tiling(B, HW, cap=8192):
    """Pick a multiple-of-128 pixel tile; keep >=2 grid steps for megacore."""
    tile = min(cap, _round_up(HW, 128))
    num_tiles = -(-HW // tile)
    # v7x has 2 TensorCores: a degenerate (1,1) grid would idle one of them.
    if B * num_tiles < 2 and HW > 128:
        tile = _round_up(-(-HW // 2), 128)
        num_tiles = -(-HW // tile)
    return tile, num_tiles


def _gelu_in_bf16():
    """bf16 GELU on v6e/v7x; f32 on v5e (no bf16 VPU/EUP) or unknown-but-v5."""
    try:
        kind = jax.devices()[0].device_kind.lower()
    except Exception:  # pragma: no cover - defensive
        return True
    return "v5" not in kind


@jax.jit
def diff_forward(x1, x2, gamma, beta, w1, b1, w2, b2):
    B, C, H, W = x1.shape
    Hc = w1.shape[1]                       # hidden channels (4*C)
    HW = H * W
    tile_hw, num_tiles = _choose_tiling(B, HW)
    HW_pad = tile_hw * num_tiles

    f32 = jnp.float32
    # Fold LayerNorm affine into the first 1x1 conv (exact algebraic rewrite,
    # done in f32 before the bf16 cast):
    #   (n*gamma + beta) @ w1 + b1 == n @ (diag(gamma) @ w1) + (beta @ w1 + b1)
    w1f = w1.astype(f32) * gamma.astype(f32)[:, None]               # (C, Hc)
    b1f = b1.astype(f32) + beta.astype(f32) @ w1.astype(f32)        # (Hc,)

    # Transposed bf16 weights for the MXU; biases as f32 column vectors.
    w1t = w1f.T.astype(jnp.bfloat16)                                # (Hc, C)
    w2t = w2.astype(f32).T.astype(jnp.bfloat16)                     # (C, Hc)
    b1c = b1f.reshape(Hc, 1)
    b2c = b2.astype(f32).reshape(C, 1)

    # Free reshape (same bytes): NCHW -> (B, C, H*W).  No transposes anywhere.
    x1r = x1.reshape(B, C, HW)
    x2r = x2.reshape(B, C, HW)
    if HW_pad != HW:
        pad = ((0, 0), (0, 0), (0, HW_pad - HW))
        x1r = jnp.pad(x1r, pad)
        x2r = jnp.pad(x2r, pad)

    grid = (B, num_tiles)
    pix_spec = pl.BlockSpec((1, C, tile_hw), lambda b, j: (b, 0, j))
    const = lambda shape: pl.BlockSpec(shape, lambda b, j: (0, 0))

    kernel = functools.partial(diff_kernel, gelu_bf16=_gelu_in_bf16())

    out_flat = pl.pallas_call(
        kernel,
        out_shape=jax.ShapeDtypeStruct((B, C, HW_pad), x1.dtype),
        grid_spec=pltpu.PrefetchScalarGridSpec(
            num_scalar_prefetch=0,
            grid=grid,
            in_specs=[
                pix_spec,                # x1 tile (1, C, T)
                pix_spec,                # x2 tile (1, C, T)
                const((Hc, C)),          # w1^T with gamma folded (bf16)
                const((Hc, 1)),          # b1 with beta folded (f32)
                const((C, Hc)),          # w2^T (bf16)
                const((C, 1)),           # b2 (f32)
            ],
            out_specs=pix_spec,
        ),
        compiler_params=pltpu.CompilerParams(
            dimension_semantics=("parallel", "parallel")),
    )(x1r, x2r, w1t, b1c, w2t, b2c)

    return out_flat[:, :, :HW].reshape(B, C, H, W)


def reference_forward(x1, x2, gamma, beta, w1, b1, w2, b2):
    """Pure-JAX f32 reference mirroring the PyTorch module semantics (erf GELU)."""
    d = jnp.abs(x1 - x2)                                            # (B, C, H, W)
    x = jnp.transpose(d, (0, 2, 3, 1)).astype(jnp.float32)          # (B, H, W, C)
    mean = jnp.mean(x, axis=-1, keepdims=True)
    var = jnp.mean((x - mean) ** 2, axis=-1, keepdims=True)
    xn = (x - mean) * jax.lax.rsqrt(var + LN_EPS) * gamma + beta
    h = jax.nn.gelu(xn @ w1 + b1, approximate=False)
    ffn = h @ w2 + b2
    out = d.astype(jnp.float32) + jnp.transpose(ffn, (0, 3, 1, 2))
    return out.astype(x1.dtype)


if __name__ == "__main__":
    B, C, H, W = 2, 32, 16, 16
    HIDDEN = 4 * C

    key = jax.random.PRNGKey(0)
    k1, k2, kw1, kw2, kg, kb = jax.random.split(key, 6)

    x1 = jax.random.normal(k1, (B, C, H, W), dtype=jnp.float32)
    x2 = jax.random.normal(k2, (B, C, H, W), dtype=jnp.float32)

    # Non-trivial gamma/beta so the LN-affine fold path is actually exercised.
    gamma = 1.0 + 0.1 * jax.random.normal(kg, (C,), dtype=jnp.float32)
    beta = 0.1 * jax.random.normal(kb, (C,), dtype=jnp.float32)
    w1 = jax.random.normal(kw1, (C, HIDDEN), dtype=jnp.float32) * 0.05
    b1 = jnp.zeros((HIDDEN,), jnp.float32)
    w2 = jax.random.normal(kw2, (HIDDEN, C), dtype=jnp.float32) * 0.05
    b2 = jnp.zeros((C,), jnp.float32)

    out = diff_forward(x1, x2, gamma, beta, w1, b1, w2, b2)
    out = jax.block_until_ready(out)

    ref = reference_forward(x1, x2, gamma, beta, w1, b1, w2, b2)
    assert out.shape == (B, C, H, W)
    # bf16 MXU operands + tanh-approx GELU -> relaxed tolerance vs f32/erf ref.
    assert jnp.allclose(out, ref, atol=2e-2, rtol=2e-2), "mismatch vs reference"

    print("KERNEL_OK")
</pallas_src>

<mosaic_0001>
module attributes {stable_mosaic.version = 11 : i64} {
  func.func @diff_kernel(%arg0: i32, %arg1: i32, %arg2: memref<1x32x256xf32, #tpu.memory_space<vmem>>, %arg3: memref<1x32x256xf32, #tpu.memory_space<vmem>>, %arg4: memref<128x32xbf16, #tpu.memory_space<vmem>>, %arg5: memref<128x1xf32, #tpu.memory_space<vmem>>, %arg6: memref<32x128xbf16, #tpu.memory_space<vmem>>, %arg7: memref<32x1xf32, #tpu.memory_space<vmem>>, %arg8: memref<1x32x256xf32, #tpu.memory_space<vmem>>) attributes {dimension_semantics = [#tpu.dimension_semantics<parallel>, #tpu.dimension_semantics<parallel>], iteration_bounds = array<i64: 2, 1>, scalar_prefetch = 0 : i64, scratch_operands = 0 : i64, tpu.core_type = #tpu.core_type<tc>, window_params = [{transform_indices = @transform_0, window_bounds = array<i64: 1, 32, 256>}, {transform_indices = @transform_1, window_bounds = array<i64: 1, 32, 256>}, {pipeline_mode = #tpu.pipeline_mode<synchronous>, transform_indices = @transform_2, window_bounds = array<i64: 128, 32>}, {pipeline_mode = #tpu.pipeline_mode<synchronous>, transform_indices = @transform_3, window_bounds = array<i64: 128, 1>}, {pipeline_mode = #tpu.pipeline_mode<synchronous>, transform_indices = @transform_4, window_bounds = array<i64: 32, 128>}, {pipeline_mode = #tpu.pipeline_mode<synchronous>, transform_indices = @transform_5, window_bounds = array<i64: 32, 1>}, {transform_indices = @transform_6, window_bounds = array<i64: 1, 32, 256>}]} {
    %c0 = arith.constant 0 : index
    %c0_0 = arith.constant 0 : index
    %c0_1 = arith.constant 0 : index
    %0 = vector.load %arg2[%c0, %c0_0, %c0_1] : memref<1x32x256xf32, #tpu.memory_space<vmem>>, vector<1x32x256xf32>
    %1 = vector.shape_cast %0 : vector<1x32x256xf32> to vector<32x256xf32>
    %c0_2 = arith.constant 0 : index
    %c0_3 = arith.constant 0 : index
    %c0_4 = arith.constant 0 : index
    %2 = vector.load %arg3[%c0_2, %c0_3, %c0_4] : memref<1x32x256xf32, #tpu.memory_space<vmem>>, vector<1x32x256xf32>
    %3 = vector.shape_cast %2 : vector<1x32x256xf32> to vector<32x256xf32>
    %4 = arith.subf %1, %3 : vector<32x256xf32>
    %5 = math.absf %4 : vector<32x256xf32>
    %cst = arith.constant dense<0.000000e+00> : vector<256xf32>
    %6 = vector.multi_reduction <add>, %5, %cst [0] : vector<32x256xf32> to vector<256xf32>
    %7 = vector.shape_cast %6 : vector<256xf32> to vector<1x256xf32>
    %cst_5 = arith.constant 3.125000e-02 : f32
    %8 = vector.broadcast %cst_5 : f32 to vector<1x256xf32>
    %9 = arith.mulf %7, %8 : vector<1x256xf32>
    %10 = arith.mulf %5, %5 : vector<32x256xf32>
    %cst_6 = arith.constant dense<0.000000e+00> : vector<256xf32>
    %11 = vector.multi_reduction <add>, %10, %cst_6 [0] : vector<32x256xf32> to vector<256xf32>
    %12 = vector.shape_cast %11 : vector<256xf32> to vector<1x256xf32>
    %cst_7 = arith.constant 3.125000e-02 : f32
    %13 = vector.broadcast %cst_7 : f32 to vector<1x256xf32>
    %14 = arith.mulf %12, %13 : vector<1x256xf32>
    %15 = arith.mulf %9, %9 : vector<1x256xf32>
    %16 = arith.subf %14, %15 : vector<1x256xf32>
    %cst_8 = arith.constant 0.000000e+00 : f32
    %17 = vector.broadcast %cst_8 : f32 to vector<1x256xf32>
    %18 = arith.maximumf %16, %17 : vector<1x256xf32>
    %19 = vector.broadcast %9 : vector<1x256xf32> to vector<32x256xf32>
    %20 = arith.subf %5, %19 : vector<32x256xf32>
    %cst_9 = arith.constant 9.99999974E-6 : f32
    %21 = vector.broadcast %cst_9 : f32 to vector<1x256xf32>
    %22 = arith.addf %18, %21 : vector<1x256xf32>
    %23 = math.rsqrt %22 : vector<1x256xf32>
    %24 = vector.broadcast %23 : vector<1x256xf32> to vector<32x256xf32>
    %25 = arith.mulf %20, %24 : vector<32x256xf32>
    %c0_10 = arith.constant 0 : index
    %c0_11 = arith.constant 0 : index
    %26 = vector.load %arg4[%c0_10, %c0_11] : memref<128x32xbf16, #tpu.memory_space<vmem>>, vector<128x32xbf16>
    %27 = arith.truncf %25 : vector<32x256xf32> to vector<32x256xbf16>
    %cst_12 = arith.constant dense<0.000000e+00> : vector<128x256xf32>
    %28 = tpu.matmul %26, %27, %cst_12 {dimension_numbers = #tpu.dot_dimension_numbers<[1], [0], [0], [1], [0, 0, 1, 1], [], []>} : vector<128x32xbf16>, vector<32x256xbf16>, vector<128x256xf32> -> vector<128x256xf32>
    %c0_13 = arith.constant 0 : index
    %c0_14 = arith.constant 0 : index
    %29 = vector.load %arg5[%c0_13, %c0_14] : memref<128x1xf32, #tpu.memory_space<vmem>>, vector<128x1xf32>
    %30 = vector.broadcast %29 : vector<128x1xf32> to vector<128x256xf32>
    %31 = arith.addf %28, %30 : vector<128x256xf32>
    %32 = arith.truncf %31 : vector<128x256xf32> to vector<128x256xbf16>
    %33 = arith.mulf %32, %32 : vector<128x256xbf16>
    %34 = arith.mulf %32, %33 : vector<128x256xbf16>
    %cst_15 = arith.constant 4.467770e-02 : bf16
    %35 = vector.broadcast %cst_15 : bf16 to vector<128x256xbf16>
    %36 = arith.mulf %35, %34 : vector<128x256xbf16>
    %37 = arith.addf %32, %36 : vector<128x256xbf16>
    %cst_16 = arith.constant 7.968750e-01 : bf16
    %38 = vector.broadcast %cst_16 : bf16 to vector<128x256xbf16>
    %39 = arith.mulf %38, %37 : vector<128x256xbf16>
    %40 = math.tanh %39 : vector<128x256xbf16>
    %cst_17 = arith.constant 1.000000e+00 : bf16
    %41 = vector.broadcast %cst_17 : bf16 to vector<128x256xbf16>
    %42 = arith.addf %41, %40 : vector<128x256xbf16>
    %cst_18 = arith.constant 5.000000e-01 : bf16
    %43 = vector.broadcast %cst_18 : bf16 to vector<128x256xbf16>
    %44 = arith.mulf %43, %42 : vector<128x256xbf16>
    %45 = arith.mulf %32, %44 : vector<128x256xbf16>
    %c0_19 = arith.constant 0 : index
    %c0_20 = arith.constant 0 : index
    %46 = vector.load %arg6[%c0_19, %c0_20] : memref<32x128xbf16, #tpu.memory_space<vmem>>, vector<32x128xbf16>
    %cst_21 = arith.constant dense<0.000000e+00> : vector<32x256xf32>
    %47 = tpu.matmul %46, %45, %cst_21 {dimension_numbers = #tpu.dot_dimension_numbers<[1], [0], [0], [1], [0, 0, 1, 1], [], []>} : vector<32x128xbf16>, vector<128x256xbf16>, vector<32x256xf32> -> vector<32x256xf32>
    %c0_22 = arith.constant 0 : index
    %c0_23 = arith.constant 0 : index
    %48 = vector.load %arg7[%c0_22, %c0_23] : memref<32x1xf32, #tpu.memory_space<vmem>>, vector<32x1xf32>
    %49 = vector.broadcast %48 : vector<32x1xf32> to vector<32x256xf32>
    %50 = arith.addf %47, %49 : vector<32x256xf32>
    %51 = arith.addf %5, %50 : vector<32x256xf32>
    %c0_24 = arith.constant 0 : index
    %c0_25 = arith.constant 0 : index
    %c0_26 = arith.constant 0 : index
    %52 = vector.load %arg8[%c0_24, %c0_25, %c0_26] : memref<1x32x256xf32, #tpu.memory_space<vmem>>, vector<1x32x256xf32>
    %53 = vector.shape_cast %52 : vector<1x32x256xf32> to vector<32x256xf32>
    %54 = vector.shape_cast %51 : vector<32x256xf32> to vector<1x32x256xf32>
    tpu.vector_store %arg8[%c0_24, %c0_25, %c0_26], %54 {strides = array<i32>} : memref<1x32x256xf32, #tpu.memory_space<vmem>>, vector<1x32x256xf32>,
    return
  }
  func.func @transform_0(%arg0: i32, %arg1: i32) -> (i32, i32, i32) {
    %c0_i32 = arith.constant 0 : i32
    %c0_i32_0 = arith.constant 0 : i32
    return %arg0, %c0_i32, %arg1 : i32, i32, i32
  }
  func.func @transform_1(%arg0: i32, %arg1: i32) -> (i32, i32, i32) {
    %c0_i32 = arith.constant 0 : i32
    %c0_i32_0 = arith.constant 0 : i32
    return %arg0, %c0_i32, %arg1 : i32, i32, i32
  }
  func.func @transform_2(%arg0: i32, %arg1: i32) -> (i32, i32) {
    %c0_i32 = arith.constant 0 : i32
    %c0_i32_0 = arith.constant 0 : i32
    %c0_i32_1 = arith.constant 0 : i32
    return %c0_i32, %c0_i32_0 : i32, i32
  }
  func.func @transform_3(%arg0: i32, %arg1: i32) -> (i32, i32) {
    %c0_i32 = arith.constant 0 : i32
    %c0_i32_0 = arith.constant 0 : i32
    %c0_i32_1 = arith.constant 0 : i32
    return %c0_i32, %c0_i32_0 : i32, i32
  }
  func.func @transform_4(%arg0: i32, %arg1: i32) -> (i32, i32) {
    %c0_i32 = arith.constant 0 : i32
    %c0_i32_0 = arith.constant 0 : i32
    %c0_i32_1 = arith.constant 0 : i32
    return %c0_i32, %c0_i32_0 : i32, i32
  }
  func.func @transform_5(%arg0: i32, %arg1: i32) -> (i32, i32) {
    %c0_i32 = arith.constant 0 : i32
    %c0_i32_0 = arith.constant 0 : i32
    %c0_i32_1 = arith.constant 0 : i32
    return %c0_i32, %c0_i32_0 : i32, i32
  }
  func.func @transform_6(%arg0: i32, %arg1: i32) -> (i32, i32, i32) {
    %c0_i32 = arith.constant 0 : i32
    %c0_i32_0 = arith.constant 0 : i32
    return %arg0, %c0_i32, %arg1 : i32, i32, i32
  }
}

</mosaic_0001>

<bundles_post_ra>
// kernel: diff_forward.1
= control target key start
LH: loop header
LB: loop body
LE: loop exit
PB: predicated region body
PF: predicated region fallthrough
CT: control target
= control target key end

     0   :  { %s1273_s21 = smov 0   ;;  %s1275_s22 = smov 0   ;;  %s1588_s0 = inlined_call_operand.vmem [shape: f32[2,32,256], index: 0, kind: input, shape index: {}]   ;;  %s1589_s1 = inlined_call_operand.vmem [shape: f32[2,32,256], index: 1, kind: input, shape index: {}]   ;;  %s1590_s2 = inlined_call_operand.vmem [shape: bf16[128,32], index: 2, kind: input, shape index: {}]   ;;  %s1591_s3 = inlined_call_operand.vmem [shape: f32[128,1], index: 3, kind: input, shape index: {}]   ;;  %s1592_s4 = inlined_call_operand.vmem [shape: bf16[32,128], index: 4, kind: input, shape index: {}]   ;;  %s1593_s5 = inlined_call_operand.vmem [shape: f32[32,1], index: 5, kind: input, shape index: {}]   ;;  %s1594_s6 = inlined_call_operand.vmem [shape: f32[2,32,256], index: 6, kind: output, shape index: {}]  }
   0x1   :  { %s1277_s23 = smov 0  }
   0x2 LB: > { %s28_s24 = sadd.s32 1, %s1231_s22  ;;  %p1110_p0 = scmp.ge.s32.totalorder %s1235_s23, 1  ;;  %s1235_s23 = sphi %s1277_s23, %s16_s23   ;;  %s1231_s22 = sphi %s1275_s22, %s1596_s22   ;;  %s1227_s21 = sphi %s1273_s21, %s1595_s21  }
   0x3   : > { %p30_p1 = scmp.ge.s32.totalorder %s28_s24, 2  ;;  %p250_p2 = scmp.lt.s32.totalorder %s1235_s23, 3 }
   0x5   : > { %s1598_s24 = smov (%p30_p1, %s28_s24), 0  ;;  %p251_p3 = pnand %p1110_p0, %p250_p2 }
   0x6   : > { %p298_p4 = scmp.lt.s32.totalorder (!%p251_p3), %s1227_s21, 1  ;;  %v1237_v0 = vmov (!%p251_p3), 0   ;;  %v458_v41 = vld [vmem:[%s1591_s3] sm:$0xff] (!%p251_p3)  ;;  %v460_v42 = vld [vmem:[%s1591_s3 + $0x10] sm:$0xff] (!%p251_p3)  ;;  %v459_v49 = vld [vmem:[%s1591_s3 + $0x8] sm:$0xff] (!%p251_p3)  ;;  %vm594_vm0 = vcmask (!%p251_p3), 261120  }
   0x7   : > { %254 = sbr.rel (%p251_p3) target bundleno = 612 (0x264), region = 44  ;;  %651 = vmatprep.mubr.bf16.mxu0 (!%p251_p3), %v1237_v0  ;;  %1165 = vset.pattern.permute.xlu0 (!%p251_p3), %v1237_v0  ;;  %v461_v54 = vld [vmem:[%s1591_s3 + $0x18] sm:$0xff] (!%p251_p3)  ;;  %v462_v59 = vld [vmem:[%s1591_s3 + $0x20] sm:$0xff] (!%p251_p3)  ;;  %v463_v60 = vld [vmem:[%s1591_s3 + $0x28] sm:$0xff] (!%p251_p3) }
   0x8   : > { %1166 = vset.pattern.permute.xlu1 (!%p251_p3), %v1237_v0  ;;  %964 = vmatprep.mubr.bf16.mxu1 (!%p251_p3), %v1237_v0 }
   0x9   : > { %476 = vperm.xlu0 (!%p251_p3), %1165, %v458_v41   ;;  %486 = vperm.xlu1 (!%p251_p3), %1166, %v460_v42   ;;  %v470_v42 = vld [vmem:[%s1591_s3 + $0x60] sm:$0xff] (!%p251_p3) }
   0xd   : > { %481 = vperm.xlu0 (!%p251_p3), %1165, %v459_v49   ;;  %491 = vperm.xlu1 (!%p251_p3), %1166, %v461_v54  }
   0xe   : > { %s1600_s21 = smov (!%p298_p4, %s1227_s21), 1 }
   0xf   : > { %s1295_s25 = sshll.u32 %s1600_s21, 6 }
  0x10   : > { %s305_s28 = scalar_lea.vmem %s1588_s0, %s1295_s25  ;;  %s315_s7 = scalar_lea.vmem %s1589_s1, %s1295_s25 }
  0x11   : > { %v333_v1 = vld [vmem:[%s305_s28 + $0x8] sm:$0xff]  ;;  %v335_v2 = vld [vmem:[%s305_s28 + $0x18] sm:$0xff]  ;;  %v332_v11 = vld [vmem:[%s305_s28] sm:$0xff]  ;;  %496 = vperm.xlu0 %1165, %v462_v59   ;;  %501 = vperm.xlu1 %1166, %v463_v60   ;;  %s1561_s10 = scalar_lea.vmem %s1594_s6, %s1295_s25 }
  0x12   : > { %v337_v3 = vld [vmem:[%s305_s28 + $0x28] sm:$0xff]  ;;  %v339_v4 = vld [vmem:[%s305_s28 + $0x38] sm:$0xff]  ;;  %v334_v14 = vld [vmem:[%s305_s28 + $0x10] sm:$0xff] }
  0x13   : > { %v341_v5 = vld [vmem:[%s315_s7 + $0x8] sm:$0xff]  ;;  %v343_v6 = vld [vmem:[%s315_s7 + $0x18] sm:$0xff]  ;;  %v336_v15 = vld [vmem:[%s305_s28 + $0x20] sm:$0xff] }
  0x14   : > { %v345_v7 = vld [vmem:[%s315_s7 + $0x28] sm:$0xff]  ;;  %v347_v8 = vld [vmem:[%s315_s7 + $0x38] sm:$0xff]  ;;  %v349_v9 = vsub.f32 %v333_v1, %v341_v5  ;;  %v351_v10 = vsub.f32 %v335_v2, %v343_v6  ;;  %v338_v16 = vld [vmem:[%s305_s28 + $0x30] sm:$0xff] }
  0x15   : > { %v353_v12 = vsub.f32 %v337_v3, %v345_v7  ;;  %v355_v13 = vsub.f32 %v339_v4, %v347_v8  ;;  %v340_v19 = vld [vmem:[%s315_s7] sm:$0xff]  ;;  %v342_v20 = vld [vmem:[%s315_s7 + $0x10] sm:$0xff] }
  0x16   : > { %v1305_v17 = vand.u32 2147483647, %v349_v9  ;;  %v1307_v18 = vand.u32 2147483647, %v351_v10  ;;  %v344_v23 = vld [vmem:[%s315_s7 + $0x20] sm:$0xff]  ;;  %v346_v24 = vld [vmem:[%s315_s7 + $0x30] sm:$0xff]  ;;  %v348_v25 = vsub.f32 %v332_v11, %v340_v19  ;;  %v350_v26 = vsub.f32 %v334_v14, %v342_v20 }
  0x17   : > { %v1309_v21 = vand.u32 2147483647, %v353_v12  ;;  %v1311_v22 = vand.u32 2147483647, %v355_v13  ;;  %v352_v30 = vsub.f32 %v336_v15, %v344_v23  ;;  %v354_v33 = vsub.f32 %v338_v16, %v346_v24  ;;  %v464_v6 = vld [vmem:[%s1591_s3 + $0x30] sm:$0xff]  ;;  %v465_v11 = vld [vmem:[%s1591_s3 + $0x38] sm:$0xff] }
  0x18   : > { %v373_v27 = vadd.f32 %v1307_v18, %v1305_v17  ;;  %v385_v28 = vmul.f32 %v1305_v17, %v1305_v17  ;;  %v387_v29 = vmul.f32 %v1307_v18, %v1307_v18  ;;  %v1323_v34 = vand.u32 2147483647, %v348_v25  ;;  %506 = vperm.xlu0 %1165, %v464_v6   ;;  %511 = vperm.xlu1 %1166, %v465_v11   ;;  %v466_v16 = vld [vmem:[%s1591_s3 + $0x40] sm:$0xff]  ;;  %v467_v25 = vld [vmem:[%s1591_s3 + $0x48] sm:$0xff] }
  0x19   : > { %v389_v31 = vmul.f32 %v1309_v21, %v1309_v21  ;;  %v391_v32 = vmul.f32 %v1311_v22, %v1311_v22  ;;  %v1326_v37 = vand.u32 2147483647, %v350_v26  ;;  %v1328_v38 = vand.u32 2147483647, %v352_v30  ;;  %v468_v30 = vld [vmem:[%s1591_s3 + $0x50] sm:$0xff] }
  0x1a   : > { %v374_v35 = vadd.f32 %v373_v27, %v1309_v21  ;;  %v401_v36 = vadd.f32 %v387_v29, %v385_v28  ;;  %v1330_v39 = vand.u32 2147483647, %v354_v33  ;;  %v384_v40 = vmul.f32 %v1323_v34, %v1323_v34 }
  0x1b   : > { %v364_v45 = vadd.f32 %v1326_v37, %v1323_v34  ;;  %v386_v46 = vmul.f32 %v1326_v37, %v1326_v37  ;;  %v388_v47 = vmul.f32 %v1328_v38, %v1328_v38 }
  0x1c   : > { %v375_v43 = vadd.f32 %v374_v35, %v1311_v22  ;;  %v402_v44 = vadd.f32 %v401_v36, %v389_v31  ;;  %v390_v48 = vmul.f32 %v1330_v39, %v1330_v39  ;;  %516 = vperm.xlu0 %1165, %v466_v16   ;;  %521 = vperm.xlu1 %1166, %v467_v25   ;;  %v1170_v16 = vld [vmem:[%s1590_s2 + $0x18] sm:$0xff]  }
  0x1d   : > { %v365_v52 = vadd.f32 %v364_v45, %v1328_v38  ;;  %v392_v53 = vadd.f32 %v386_v46, %v384_v40 }
  0x1e   : > { %v376_v50 = vrot.slane %v375_v43, 4  ;;  %v403_v51 = vadd.f32 %v402_v44, %v391_v32  ;;  %v469_v32 = vld [vmem:[%s1591_s3 + $0x58] sm:$0xff]  ;;  %v471_v44 = vld [vmem:[%s1591_s3 + $0x68] sm:$0xff] }
  0x1f   : > { %v366_v57 = vadd.f32 %v365_v52, %v1330_v39  ;;  %v393_v58 = vadd.f32 %v392_v53, %v388_v47  ;;  %v472_v47 = vld [vmem:[%s1591_s3 + $0x70] sm:$0xff] }
  0x20   : > { %v377_v55 = vadd.f32 %v376_v50, %v375_v43  ;;  %v404_v56 = vrot.slane %v403_v51, 4  ;;  %526 = vperm.xlu0 %1165, %v468_v30   ;;  %531 = vperm.xlu1 %1166, %v469_v32   ;;  %v896_v50 = vld [vmem:[%s1593_s5] sm:$0xff] }
  0x21   : > { %v367_v63 = vrot.slane %v366_v57, 4  ;;  %v394_v1 = vadd.f32 %v393_v58, %v390_v48  ;;  %v473_v48 = vld [vmem:[%s1591_s3 + $0x78] sm:$0xff] }
  0x22   : > { %v378_v61 = vrot.slane %v377_v55, 2  ;;  %v405_v62 = vadd.f32 %v404_v56, %v403_v51  ;;  %v897_v51 = vld [vmem:[%s1593_s5 + $0x8] sm:$0xff]  ;;  %v898_v56 = vld [vmem:[%s1593_s5 + $0x10] sm:$0xff]  ;;  %v899_v58 = vld [vmem:[%s1593_s5 + $0x18] sm:$0xff] }
  0x23   : > { %v368_v4 = vadd.f32 %v367_v63, %v366_v57  ;;  %v395_v5 = vrot.slane %v394_v1, 4 }
  0x24   : > { %v379_v2 = vadd.f32 %v378_v61, %v377_v55  ;;  %v406_v3 = vrot.slane %v405_v62, 2  ;;  %536 = vperm.xlu0 %1165, %v470_v42   ;;  %541 = vperm.xlu1 %1166, %v471_v44  }
  0x25   : > { %v369_v9 = vrot.slane %v368_v4, 2  ;;  %v396_v10 = vadd.f32 %v395_v5, %v394_v1 }
  0x26   : > { %v380_v7 = vrot.slane %v379_v2, 1  ;;  %v407_v8 = vadd.f32 %v406_v3, %v405_v62 }
  0x27   : > { %v370_v14 = vadd.f32 %v369_v9, %v368_v4  ;;  %v397_v15 = vrot.slane %v396_v10, 2 }
  0x28   : > { %v381_v12 = vadd.f32 %v380_v7, %v379_v2  ;;  %v408_v13 = vrot.slane %v407_v8, 1  ;;  %546 = vperm.xlu0 %1165, %v472_v47   ;;  %551 = vperm.xlu1 %1166, %v473_v48  }
  0x29   : > { %v371_v23 = vrot.slane %v370_v14, 1  ;;  %v398_v24 = vadd.f32 %v397_v15, %v396_v10  ;;  %v1169_v15 = vld [vmem:[%s1590_s2 + $0x10] sm:$0xff]  }
  0x2a   : > { %v383_v19 = vmul.f32 0.03125, %v381_v12  ;;  %v409_v20 = vadd.f32 %v408_v13, %v407_v8  ;;  %v1167_v13 = vld [vmem:[%s1590_s2] sm:$0xff]  }
  0x2b   : > { %v372_v28 = vadd.f32 %v371_v23, %v370_v14  ;;  %v399_v29 = vrot.slane %v398_v24, 1  ;;  %v1168_v14 = vld [vmem:[%s1590_s2 + $0x8] sm:$0xff]   ;;  %v1173_v23 = vld [vmem:[%s1590_s2 + $0x30] sm:$0xff]  }
  0x2c   : > { %v411_v26 = vmul.f32 0.03125, %v409_v20  ;;  %v413_v27 = vmul.f32 %v383_v19, %v383_v19  ;;  %v419_v52 = vsub.f32 %v1305_v17, %v383_v19  ;;  %v421_v53 = vsub.f32 %v1307_v18, %v383_v19  ;;  %902 = vperm.xlu0 %1165, %v896_v50   ;;  %907 = vperm.xlu1 %1166, %v897_v51   ;;  %v1172_v20 = vld [vmem:[%s1590_s2 + $0x28] sm:$0xff]  }
  0x2d   : > { %v382_v33 = vmul.f32 0.03125, %v372_v28  ;;  %v400_v35 = vadd.f32 %v399_v29, %v398_v24  ;;  %v423_v54 = vsub.f32 %v1309_v21, %v383_v19  ;;  %v425_v55 = vsub.f32 %v1311_v22, %v383_v19  ;;  %v1171_v19 = vld [vmem:[%s1590_s2 + $0x20] sm:$0xff]   ;;  %v1174_v24 = vld [vmem:[%s1590_s2 + $0x38] sm:$0xff]  }
  0x2e   : > { %v415_v31 = vsub.f32 %v411_v26, %v413_v27 }
  0x2f   : > { %v410_v40 = vmul.f32 0.03125, %v400_v35  ;;  %v412_v41 = vmul.f32 %v382_v33, %v382_v33  ;;  %v418_v61 = vsub.f32 %v1323_v34, %v382_v33  ;;  %v420_v62 = vsub.f32 %v1326_v37, %v382_v33 }
  0x30   : > { %v417_v36 = vmax.f32 %v415_v31, 0.0  ;;  %v422_v63 = vsub.f32 %v1328_v38, %v382_v33  ;;  %v424_v1 = vsub.f32 %v1330_v39, %v382_v33  ;;  %912 = vperm.xlu0 %1165, %v898_v56   ;;  %917 = vperm.xlu1 %1166, %v899_v58  }
  0x31   : > { %v414_v45 = vsub.f32 %v410_v40, %v412_v41 }
  0x32   : > { %v427_v43 = vadd.f32 1e-05, %v417_v36 }
  0x33   : > { %v416_v46 = vmax.f32 %v414_v45, 0.0 }
  0x34   : > { %1177 = vrsqrt.f32 %v427_v43 }
  0x35   : > { %v426_v49 = vadd.f32 1e-05, %v416_v46 }
  0x37   : > { %1179 = vrsqrt.f32 %v426_v49 }
  0x3e   : > { %v1178_v57 = vpop.eup %1177 }
  0x3f   : > { %v431_v59 = vmul.f32 %v1178_v57, %v419_v52  ;;  %v433_v60 = vmul.f32 %v1178_v57, %v421_v53  ;;  %v435_v3 = vmul.f32 %v1178_v57, %v423_v54  ;;  %v437_v4 = vmul.f32 %v1178_v57, %v425_v55 }
  0x41   : > { %v455_v2 = vpack.c.bf16 %v433_v60, %v431_v59  ;;  %v1180_v5 = vpop.eup %1179  ;;  %v457_v10 = vpack.c.bf16 %v437_v4, %v435_v3 }
  0x42   : > { %v430_v6 = vmul.f32 %v1180_v5, %v418_v61  ;;  %v432_v7 = vmul.f32 %v1180_v5, %v420_v62  ;;  %v434_v8 = vmul.f32 %v1180_v5, %v422_v63  ;;  %v436_v9 = vmul.f32 %v1180_v5, %v424_v1 }
  0x43   : > { %619 = vmatprep.subr.bf16.mxu0 %v455_v2 }
  0x44   : > { %v454_v11 = vpack.c.bf16 %v432_v7, %v430_v6  ;;  %v456_v12 = vpack.c.bf16 %v436_v9, %v434_v8 }
  0x46   : > { %620 = vmatpush1.bf16.msra.mxu0 %v454_v11 }
  0x47   : > { %621 = vmatprep.subr.bf16.mxu0 %v457_v10 }
  0x4a   : > { %622 = vmatpush1.bf16.msra.mxu0 %v456_v12 }
  0x4d   : > { %1125 = vmatmul.mubr.msk.bf16.vlgmr.msra.gmra.mrb[0].mxu0 %vm594_vm0, %v1167_v13 }
  0x4e   : > { %661 = vmatprep.mubr.bf16.mxu0 %v1237_v0 }
  0x55   : > { %1126 = vmatmul.mubr.msk.bf16.gmra.mrb[4].mxu0 %vm594_vm0, %v1168_v14 }
  0x56   : > { %671 = vmatprep.mubr.bf16.mxu0 %v1237_v0 }
  0x5d   : > { %1127 = vmatmul.mubr.msk.bf16.gmra.mrb[8].mxu0 %vm594_vm0, %v1169_v15 }
  0x5e   : > { %681 = vmatprep.mubr.bf16.mxu0 %v1237_v0 }
  0x65   : > { %1128 = vmatmul.mubr.msk.bf16.gmra.mrb[12].mxu0 %vm594_vm0, %v1170_v16 }
  0x66   : > { %691 = vmatprep.mubr.bf16.mxu0 %v1237_v0 }
  0x6d   : > { %1129 = vmatmul.mubr.msk.bf16.gmra.mrb[16].mxu0 %vm594_vm0, %v1171_v19 }
  0x6e   : > { %701 = vmatprep.mubr.bf16.mxu0 %v1237_v0 }
  0x75   : > { %1130 = vmatmul.mubr.msk.bf16.gmra.mrb[20].mxu0 %vm594_vm0, %v1172_v20 }
  0x76   : > { %711 = vmatprep.mubr.bf16.mxu0 %v1237_v0 }
  0x7d   : > { %1131 = vmatmul.mubr.msk.bf16.gmra.mrb[24].mxu0 %vm594_vm0, %v1173_v23 }
  0x7e   : > { %721 = vmatprep.mubr.bf16.mxu0 %v1237_v0 }
  0x85   : > { %1132 = vmatmul.mubr.msk.bf16.gmra.mrb[28].mxu0 %vm594_vm0, %v1174_v24 }
  0x88   : > { %v477_v25 = vpop.permute.xlu0 %476  ;;  %v487_v33 = vpop.permute.xlu1 %486 }
  0x8c   : > { %v482_v28 = vpop.permute.xlu0 %481  ;;  %v492_v47 = vpop.permute.xlu1 %491 }
  0x90   : > { %v497_v3 = vpop.permute.xlu0 %496  ;;  %v502_v6 = vpop.permute.xlu1 %501 }
 0x120   : > { %v653_v26 = vpop.f32.mrb[0].mxu0 }
 0x121   : > { %v655_v27 = vpop.f32.mrb[1].mxu0  ;;  %v654_v30 = vadd.f32 %v653_v26, %v477_v25 }
 0x122   : > { %v657_v29 = vpop.f32.mrb[2].mxu0  ;;  %v656_v35 = vadd.f32 %v655_v27, %v477_v25 }
 0x123   : > { %v658_v31 = vadd.f32 %v657_v29, %v482_v28  ;;  %v659_v32 = vpop.f32.mrb[3].mxu0  ;;  %v507_v29 = vpop.permute.xlu0 %506 }
 0x124   : > { %v660_v36 = vadd.f32 %v659_v32, %v482_v28  ;;  %v512_v32 = vpop.permute.xlu1 %511 }
 0x125   : > { %v1452_v40 = vpack.c.bf16 %v658_v31, %v654_v30 }
 0x126   : > { %v1454_v41 = vpack.c.bf16 %v660_v36, %v656_v35 }
 0x127   : > { %v748_v42 = vmul.bf16 %v1452_v40, %v1452_v40 }
 0x128   : > { %v749_v43 = vmul.bf16 %v1454_v41, %v1454_v41  ;;  %v663_v44 = vpop.f32.mrb[4].mxu0 }
 0x129   : > { %v665_v45 = vpop.f32.mrb[5].mxu0  ;;  %v764_v46 = vmul.bf16 %v748_v42, %v1452_v40  ;;  %v664_v50 = vadd.f32 %v663_v44, %v487_v33 }
 0x12a   : > { %v667_v48 = vpop.f32.mrb[6].mxu0  ;;  %v765_v49 = vmul.bf16 %v749_v43, %v1454_v41  ;;  %v666_v54 = vadd.f32 %v665_v45, %v487_v33 }
 0x12b   : > { %v668_v51 = vadd.f32 %v667_v48, %v492_v47  ;;  %v669_v52 = vpop.f32.mrb[7].mxu0  ;;  %v780_v53 = vmul.bf16 1027030327, %v764_v46 }
 0x12c   : > { %v670_v55 = vadd.f32 %v669_v52, %v492_v47  ;;  %v781_v56 = vmul.bf16 1027030327, %v765_v49 }
 0x12d   : > { %v1462_v57 = vpack.c.bf16 %v668_v51, %v664_v50  ;;  %v796_v58 = vadd.bf16 %v780_v53, %v1452_v40 }
 0x12e   : > { %v1465_v59 = vpack.c.bf16 %v670_v55, %v666_v54  ;;  %v797_v60 = vadd.bf16 %v781_v56, %v1454_v41 }
 0x12f   : > { %v750_v61 = vmul.bf16 %v1462_v57, %v1462_v57  ;;  %v812_v62 = vmul.bf16 1061961548, %v796_v58 }
 0x130   : > { %v751_v63 = vmul.bf16 %v1465_v59, %v1465_v59  ;;  %v673_v1 = vpop.f32.mrb[8].mxu0  ;;  %v813_v2 = vmul.bf16 1061961548, %v797_v60 }
 0x131   : > { %v766_v4 = vmul.bf16 %v750_v61, %v1462_v57  ;;  %v675_v5 = vpop.f32.mrb[9].mxu0  ;;  %1181 = vtanh.bf16 %v812_v62  ;;  %v674_v10 = vadd.f32 %v673_v1, %v497_v3 }
 0x132   : > { %v767_v7 = vmul.bf16 %v751_v63, %v1465_v59  ;;  %v677_v8 = vpop.f32.mrb[10].mxu0  ;;  %1183 = vtanh.bf16 %v813_v2  ;;  %v676_v14 = vadd.f32 %v675_v5, %v497_v3  ;;  %v517_v2 = vpop.permute.xlu0 %516 }
 0x133   : > { %v782_v9 = vmul.bf16 1027030327, %v766_v4  ;;  %v678_v11 = vadd.f32 %v677_v8, %v502_v6  ;;  %v679_v12 = vpop.f32.mrb[11].mxu0  ;;  %v522_v5 = vpop.permute.xlu1 %521 }
 0x134   : > { %v783_v13 = vmul.bf16 1027030327, %v767_v7  ;;  %v680_v15 = vadd.f32 %v679_v12, %v502_v6 }
 0x135   : > { %v1474_v16 = vpack.c.bf16 %v678_v11, %v674_v10  ;;  %v798_v19 = vadd.bf16 %v782_v9, %v1462_v57 }
 0x136   : > { %v1477_v20 = vpack.c.bf16 %v680_v15, %v676_v14  ;;  %v799_v23 = vadd.bf16 %v783_v13, %v1465_v59 }
 0x137   : > { %v752_v24 = vmul.bf16 %v1474_v16, %v1474_v16  ;;  %v814_v25 = vmul.bf16 1061961548, %v798_v19 }
 0x138   : > { %v753_v26 = vmul.bf16 %v1477_v20, %v1477_v20  ;;  %v683_v27 = vpop.f32.mrb[12].mxu0  ;;  %v815_v28 = vmul.bf16 1061961548, %v799_v23 }
 0x139   : > { %v768_v30 = vmul.bf16 %v752_v24, %v1474_v16  ;;  %v685_v31 = vpop.f32.mrb[13].mxu0  ;;  %1185 = vtanh.bf16 %v814_v25  ;;  %v684_v42 = vadd.f32 %v683_v27, %v507_v29 }
 0x13a   : > { %v769_v33 = vmul.bf16 %v753_v26, %v1477_v20  ;;  %v687_v35 = vpop.f32.mrb[14].mxu0  ;;  %1187 = vtanh.bf16 %v815_v28  ;;  %v686_v47 = vadd.f32 %v685_v31, %v507_v29 }
 0x13b   : > { %v784_v36 = vmul.bf16 1027030327, %v768_v30  ;;  %v688_v43 = vadd.f32 %v687_v35, %v512_v32  ;;  %v689_v44 = vpop.f32.mrb[15].mxu0 }
 0x13c   : > { %v1182_v45 = vpop.eup %1181  ;;  %v785_v46 = vmul.bf16 1027030327, %v769_v33  ;;  %v690_v48 = vadd.f32 %v689_v44, %v512_v32 }
 0x13d   : > { %v1184_v49 = vpop.eup %1183  ;;  %v1486_v50 = vpack.c.bf16 %v688_v43, %v684_v42  ;;  %v844_v51 = vadd.bf16 1065369472, %v1182_v45  ;;  %v800_v52 = vadd.bf16 %v784_v36, %v1474_v16  ;;  %v527_v42 = vpop.permute.xlu0 %526 }
 0x13e   : > { %v1489_v53 = vpack.c.bf16 %v690_v48, %v686_v47  ;;  %v845_v54 = vadd.bf16 1065369472, %v1184_v49  ;;  %v801_v55 = vadd.bf16 %v785_v46, %v1477_v20  ;;  %v532_v45 = vpop.permute.xlu1 %531 }
 0x13f   : > { %v754_v56 = vmul.bf16 %v1486_v50, %v1486_v50  ;;  %v860_v58 = vmul.bf16 1056980736, %v844_v51  ;;  %v816_v60 = vmul.bf16 1061961548, %v800_v52 }
 0x140   : > { %v755_v61 = vmul.bf16 %v1489_v53, %v1489_v53  ;;  %v693_v62 = vpop.f32.mrb[16].mxu0  ;;  %v861_v63 = vmul.bf16 1056980736, %v845_v54  ;;  %v817_v1 = vmul.bf16 1061961548, %v801_v55 }
 0x141   : > { %v770_v3 = vmul.bf16 %v754_v56, %v1486_v50  ;;  %v695_v4 = vpop.f32.mrb[17].mxu0  ;;  %1189 = vtanh.bf16 %v816_v60  ;;  %v694_v10 = vadd.f32 %v693_v62, %v517_v2  ;;  %v876_v13 = vmul.bf16 %v860_v58, %v1452_v40 }
 0x142   : > { %v771_v6 = vmul.bf16 %v755_v61, %v1489_v53  ;;  %v697_v7 = vpop.f32.mrb[18].mxu0  ;;  %v877_v8 = vmul.bf16 %v861_v63, %v1454_v41  ;;  %1191 = vtanh.bf16 %v817_v1  ;;  %v696_v19 = vadd.f32 %v695_v4, %v517_v2 }
 0x143   : > { %v786_v9 = vmul.bf16 1027030327, %v770_v3  ;;  %v698_v11 = vadd.f32 %v697_v7, %v522_v5  ;;  %v699_v12 = vpop.f32.mrb[19].mxu0 }
 0x144   : > { %v1186_v14 = vpop.eup %1185  ;;  %v787_v15 = vmul.bf16 1027030327, %v771_v6  ;;  %v700_v23 = vadd.f32 %v699_v12, %v522_v5  ;;  %932 = vmatprep.subr.bf16.mxu1 %v877_v8 }
 0x145   : > { %v1188_v24 = vpop.eup %1187  ;;  %v1500_v25 = vpack.c.bf16 %v698_v11, %v694_v10  ;;  %933 = vmatpush1.bf16.msra.mxu1 %v876_v13  ;;  %v846_v26 = vadd.bf16 1065369472, %v1186_v14  ;;  %v802_v27 = vadd.bf16 %v786_v9, %v1486_v50  ;;  %v537_v11 = vpop.permute.xlu0 %536 }
 0x146   : > { %v1503_v41 = vpack.c.bf16 %v700_v23, %v696_v19  ;;  %v847_v28 = vadd.bf16 1065369472, %v1188_v24  ;;  %v803_v29 = vadd.bf16 %v787_v15, %v1489_v53  ;;  %v542_v14 = vpop.permute.xlu1 %541 }
 0x147   : > { %v756_v40 = vmul.bf16 %v1500_v25, %v1500_v25  ;;  %v862_v30 = vmul.bf16 1056980736, %v846_v26  ;;  %v818_v31 = vmul.bf16 1061961548, %v802_v27 }
 0x148   : > { %v757_v32 = vmul.bf16 %v1503_v41, %v1503_v41  ;;  %v703_v33 = vpop.f32.mrb[20].mxu0  ;;  %v863_v35 = vmul.bf16 1056980736, %v847_v28  ;;  %v819_v36 = vmul.bf16 1061961548, %v803_v29 }
 0x149   : > { %v772_v43 = vmul.bf16 %v756_v40, %v1500_v25  ;;  %v705_v44 = vpop.f32.mrb[21].mxu0  ;;  %1193 = vtanh.bf16 %v818_v31  ;;  %v704_v51 = vadd.f32 %v703_v33, %v527_v42  ;;  %v878_v55 = vmul.bf16 %v862_v30, %v1462_v57 }
 0x14a   : > { %v773_v46 = vmul.bf16 %v757_v32, %v1503_v41  ;;  %v707_v47 = vpop.f32.mrb[22].mxu0  ;;  %v879_v48 = vmul.bf16 %v863_v35, %v1465_v59  ;;  %1195 = vtanh.bf16 %v819_v36  ;;  %v706_v60 = vadd.f32 %v705_v44, %v527_v42 }
 0x14b   : > { %v788_v49 = vmul.bf16 1027030327, %v772_v43  ;;  %v708_v52 = vadd.f32 %v707_v47, %v532_v45  ;;  %v709_v54 = vpop.f32.mrb[23].mxu0 }
 0x14c   : > { %v1190_v56 = vpop.eup %1189  ;;  %v789_v58 = vmul.bf16 1027030327, %v773_v46  ;;  %v710_v61 = vadd.f32 %v709_v54, %v532_v45  ;;  %934 = vmatprep.subr.bf16.mxu1 %v879_v48 }
 0x14d   : > { %v1192_v62 = vpop.eup %1191  ;;  %v1514_v63 = vpack.c.bf16 %v708_v52, %v704_v51  ;;  %935 = vmatpush1.bf16.msra.mxu1 %v878_v55  ;;  %v848_v1 = vadd.bf16 1065369472, %v1190_v56  ;;  %v804_v2 = vadd.bf16 %v788_v49, %v1500_v25  ;;  %v547_v52 = vpop.permute.xlu0 %546 }
 0x14e   : > { %v1517_v59 = vpack.c.bf16 %v710_v61, %v706_v60  ;;  %v849_v3 = vadd.bf16 1065369472, %v1192_v62  ;;  %v805_v4 = vadd.bf16 %v789_v58, %v1503_v41  ;;  %v552_v56 = vpop.permute.xlu1 %551 }
 0x14f   : > { %v758_v57 = vmul.bf16 %v1514_v63, %v1514_v63  ;;  %v864_v5 = vmul.bf16 1056980736, %v848_v1  ;;  %v820_v6 = vmul.bf16 1061961548, %v804_v2 }
 0x150   : > { %v759_v7 = vmul.bf16 %v1517_v59, %v1517_v59  ;;  %v713_v8 = vpop.f32.mrb[24].mxu0  ;;  %v865_v9 = vmul.bf16 1056980736, %v849_v3  ;;  %v821_v10 = vmul.bf16 1061961548, %v805_v4 }
 0x151   : > { %v774_v12 = vmul.bf16 %v758_v57, %v1514_v63  ;;  %v715_v13 = vpop.f32.mrb[25].mxu0  ;;  %1197 = vtanh.bf16 %v820_v6  ;;  %v714_v26 = vadd.f32 %v713_v8, %v537_v11  ;;  %v880_v29 = vmul.bf16 %v864_v5, %v1474_v16 }
 0x152   : > { %v775_v15 = vmul.bf16 %v759_v7, %v1517_v59  ;;  %v717_v19 = vpop.f32.mrb[26].mxu0  ;;  %v881_v23 = vmul.bf16 %v865_v9, %v1477_v20  ;;  %1199 = vtanh.bf16 %v821_v10  ;;  %v716_v31 = vadd.f32 %v715_v13, %v537_v11 }
 0x153   : > { %v790_v24 = vmul.bf16 1027030327, %v774_v12  ;;  %v718_v27 = vadd.f32 %v717_v19, %v542_v14  ;;  %v719_v28 = vpop.f32.mrb[27].mxu0 }
 0x154   : > { %v1194_v40 = vpop.eup %1193  ;;  %v791_v30 = vmul.bf16 1027030327, %v775_v15  ;;  %v720_v32 = vadd.f32 %v719_v28, %v542_v14  ;;  %936 = vmatprep.subr.bf16.mxu1 %v881_v23 }
 0x155   : > { %v1196_v33 = vpop.eup %1195  ;;  %v1528_v35 = vpack.c.bf16 %v718_v27, %v714_v26  ;;  %937 = vmatpush1.bf16.msra.mxu1 %v880_v29  ;;  %v850_v36 = vadd.bf16 1065369472, %v1194_v40  ;;  %v806_v42 = vadd.bf16 %v790_v24, %v1514_v63 }
 0x156   : > { %v1531_v20 = vpack.c.bf16 %v720_v32, %v716_v31  ;;  %v851_v43 = vadd.bf16 1065369472, %v1196_v33  ;;  %v807_v44 = vadd.bf16 %v791_v30, %v1517_v59 }
 0x157   : > { %v760_v16 = vmul.bf16 %v1528_v35, %v1528_v35  ;;  %v866_v45 = vmul.bf16 1056980736, %v850_v36  ;;  %v822_v46 = vmul.bf16 1061961548, %v806_v42 }
 0x158   : > { %v761_v47 = vmul.bf16 %v1531_v20, %v1531_v20  ;;  %v723_v48 = vpop.f32.mrb[28].mxu0  ;;  %v867_v49 = vmul.bf16 1056980736, %v851_v43  ;;  %v823_v51 = vmul.bf16 1061961548, %v807_v44 }
 0x159   : > { %v776_v54 = vmul.bf16 %v760_v16, %v1528_v35  ;;  %v725_v55 = vpop.f32.mrb[29].mxu0  ;;  %1201 = vtanh.bf16 %v822_v46  ;;  %v724_v1 = vadd.f32 %v723_v48, %v547_v52  ;;  %v882_v4 = vmul.bf16 %v866_v45, %v1486_v50 }
 0x15a   : > { %v777_v58 = vmul.bf16 %v761_v47, %v1531_v20  ;;  %v727_v60 = vpop.f32.mrb[30].mxu0  ;;  %v883_v61 = vmul.bf16 %v867_v49, %v1489_v53  ;;  %1203 = vtanh.bf16 %v823_v51  ;;  %v726_v6 = vadd.f32 %v725_v55, %v547_v52 }
 0x15b   : > { %v792_v62 = vmul.bf16 1027030327, %v776_v54  ;;  %v728_v2 = vadd.f32 %v727_v60, %v552_v56  ;;  %v729_v3 = vpop.f32.mrb[31].mxu0 }
 0x15c   : > { %v1198_v57 = vpop.eup %1197  ;;  %v793_v5 = vmul.bf16 1027030327, %v777_v58  ;;  %v730_v7 = vadd.f32 %v729_v3, %v552_v56  ;;  %938 = vmatprep.subr.bf16.mxu1 %v883_v61  ;;  %v1175_v3 = vld [vmem:[%s1592_s4] sm:$0xff]  }
 0x15d   : > { %v1200_v8 = vpop.eup %1199  ;;  %v746_v9 = vpack.c.bf16 %v728_v2, %v724_v1  ;;  %939 = vmatpush1.bf16.msra.mxu1 %v882_v4  ;;  %v852_v10 = vadd.bf16 1065369472, %v1198_v57  ;;  %v808_v11 = vadd.bf16 %v792_v62, %v1528_v35 }
 0x15e   : > { %v747_v12 = vpack.c.bf16 %v730_v7, %v726_v6  ;;  %v853_v53 = vadd.bf16 1065369472, %v1200_v8  ;;  %v809_v13 = vadd.bf16 %v793_v5, %v1531_v20  ;;  %v908_v6 = vpop.permute.xlu1 %907 }
 0x15f   : > { %v762_v14 = vmul.bf16 %v746_v9, %v746_v9  ;;  %v868_v15 = vmul.bf16 1056980736, %v852_v10  ;;  %v824_v19 = vmul.bf16 1061961548, %v808_v11 }
 0x160   : > { %v763_v23 = vmul.bf16 %v747_v12, %v747_v12  ;;  %v869_v50 = vmul.bf16 1056980736, %v853_v53  ;;  %v825_v24 = vmul.bf16 1061961548, %v809_v13 }
 0x161   : > { %v778_v26 = vmul.bf16 %v762_v14, %v746_v9  ;;  %1205 = vtanh.bf16 %v824_v19  ;;  %v884_v40 = vmul.bf16 %v868_v15, %v1500_v25 }
 0x162   : > { %v779_v27 = vmul.bf16 %v763_v23, %v747_v12  ;;  %v885_v28 = vmul.bf16 %v869_v50, %v1503_v41  ;;  %1207 = vtanh.bf16 %v825_v24  ;;  %v918_v23 = vpop.permute.xlu1 %917 }
 0x163   : > { %v794_v29 = vmul.bf16 1027030327, %v778_v26 }
 0x164   : > { %v1202_v30 = vpop.eup %1201  ;;  %v795_v31 = vmul.bf16 1027030327, %v779_v27  ;;  %940 = vmatprep.subr.bf16.mxu1 %v885_v28 }
 0x165   : > { %v1204_v32 = vpop.eup %1203  ;;  %941 = vmatpush1.bf16.msra.mxu1 %v884_v40  ;;  %v854_v33 = vadd.bf16 1065369472, %v1202_v30  ;;  %v810_v36 = vadd.bf16 %v794_v29, %v746_v9 }
 0x166   : > { %v855_v42 = vadd.bf16 1065369472, %v1204_v32  ;;  %v811_v43 = vadd.bf16 %v795_v31, %v747_v12 }
 0x167   : > { %v870_v44 = vmul.bf16 1056980736, %v854_v33  ;;  %v826_v16 = vmul.bf16 1061961548, %v810_v36 }
 0x168   : > { %v871_v45 = vmul.bf16 1056980736, %v855_v42  ;;  %v827_v46 = vmul.bf16 1061961548, %v811_v43 }
 0x169   : > { %1209 = vtanh.bf16 %v826_v16  ;;  %v886_v47 = vmul.bf16 %v870_v44, %v1514_v63 }
 0x16a   : > { %v887_v41 = vmul.bf16 %v871_v45, %v1517_v59  ;;  %1211 = vtanh.bf16 %v827_v46 }
 0x16c   : > { %v1206_v25 = vpop.eup %1205  ;;  %942 = vmatprep.subr.bf16.mxu1 %v887_v41 }
 0x16d   : > { %v1208_v48 = vpop.eup %1207  ;;  %943 = vmatpush1.bf16.msra.mxu1 %v886_v47  ;;  %v856_v49 = vadd.bf16 1065369472, %v1206_v25 }
 0x16e   : > { %v857_v51 = vadd.bf16 1065369472, %v1208_v48 }
 0x16f   : > { %v872_v52 = vmul.bf16 1056980736, %v856_v49 }
 0x170   : > { %v873_v54 = vmul.bf16 1056980736, %v857_v51 }
 0x171   : > { %v888_v56 = vmul.bf16 %v872_v52, %v1528_v35  ;;  %v1176_v35 = vld [vmem:[%s1592_s4 + $0x8] sm:$0xff]  }
 0x172   : > { %v889_v55 = vmul.bf16 %v873_v54, %v1531_v20  ;;  %v903_v20 = vpop.permute.xlu0 %902 }
 0x174   : > { %v1210_v58 = vpop.eup %1209  ;;  %944 = vmatprep.subr.bf16.mxu1 %v889_v55 }
 0x175   : > { %v1212_v60 = vpop.eup %1211  ;;  %945 = vmatpush1.bf16.msra.mxu1 %v888_v56  ;;  %v858_v59 = vadd.bf16 1065369472, %v1210_v58 }
 0x176   : > { %v859_v61 = vadd.bf16 1065369472, %v1212_v60  ;;  %v913_v14 = vpop.permute.xlu0 %912 }
 0x177   : > { %v874_v62 = vmul.bf16 1056980736, %v858_v59 }
 0x178   : > { %v875_v63 = vmul.bf16 1056980736, %v859_v61 }
 0x179   : > { %v890_v2 = vmul.bf16 %v874_v62, %v746_v9 }
 0x17a   : > { %v891_v1 = vmul.bf16 %v875_v63, %v747_v12 }
 0x17c   : > { %946 = vmatprep.subr.bf16.mxu1 %v891_v1 }
 0x17d   : > { %947 = vmatpush1.bf16.msra.mxu1 %v890_v2 }
 0x180   : > { %965 = vmatmul.mubr.bf16.vlgmr.msra.gmra.mrb[0].mxu1 %v1175_v3 }
 0x181   : > { %974 = vmatprep.mubr.bf16.mxu1 %v1237_v0 }
 0x188   : > { %975 = vmatmul.mubr.bf16.gmra.mrb[4].mxu1 %v1176_v35 }
 0x253   : > { %v966_v4 = vpop.f32.mrb[0].mxu1 }
 0x254   : > { %v967_v57 = vadd.f32 %v966_v4, %v903_v20  ;;  %v968_v5 = vpop.f32.mrb[1].mxu1 }
 0x255   : > { %v969_v0 = vadd.f32 %v968_v5, %v903_v20  ;;  %v970_v7 = vpop.f32.mrb[2].mxu1 }
 0x256   : > { %v985_v8 = vadd.f32 %v967_v57, %v1323_v34  ;;  %v971_v9 = vadd.f32 %v970_v7, %v908_v6  ;;  %v972_v10 = vpop.f32.mrb[3].mxu1 }
 0x257   : > { %v986_v11 = vadd.f32 %v969_v0, %v1305_v17  ;;  %v973_v12 = vadd.f32 %v972_v10, %v908_v6 }
 0x258   : > { %993 = vst [vmem:[%s1561_s10] sm:$0xff] %v985_v8  ;;  %v987_v53 = vadd.f32 %v971_v9, %v1326_v37 }
 0x259   : > { %994 = vst [vmem:[%s1561_s10 + $0x8] sm:$0xff] %v986_v11  ;;  %v988_v13 = vadd.f32 %v973_v12, %v1307_v18 }
 0x25a   : > { %995 = vst [vmem:[%s1561_s10 + $0x10] sm:$0xff] %v987_v53 }
 0x25b   : > { %996 = vst [vmem:[%s1561_s10 + $0x18] sm:$0xff] %v988_v13  ;;  %v976_v15 = vpop.f32.mrb[4].mxu1 }
 0x25c   : > { %v977_v34 = vadd.f32 %v976_v15, %v913_v14  ;;  %v978_v19 = vpop.f32.mrb[5].mxu1 }
 0x25d   : > { %v979_v50 = vadd.f32 %v978_v19, %v913_v14  ;;  %v980_v17 = vpop.f32.mrb[6].mxu1 }
 0x25e   : > { %v989_v24 = vadd.f32 %v977_v34, %v1328_v38  ;;  %v981_v26 = vadd.f32 %v980_v17, %v918_v23  ;;  %v982_v37 = vpop.f32.mrb[7].mxu1 }
 0x25f   : > { %v990_v27 = vadd.f32 %v979_v50, %v1309_v21  ;;  %v983_v28 = vadd.f32 %v982_v37, %v918_v23 }
 0x260   : > { %997 = vst [vmem:[%s1561_s10 + $0x20] sm:$0xff] %v989_v24  ;;  %v991_v18 = vadd.f32 %v981_v26, %v1330_v39 }
 0x261   : > { %998 = vst [vmem:[%s1561_s10 + $0x28] sm:$0xff] %v990_v27  ;;  %v992_v29 = vadd.f32 %v983_v28, %v1311_v22 }
 0x262   : > { %999 = vst [vmem:[%s1561_s10 + $0x30] sm:$0xff] %v991_v18 }
 0x263   : > { %1000 = vst [vmem:[%s1561_s10 + $0x38] sm:$0xff] %v992_v29 }
 0x264 PF: > { %s16_s23 = sadd.s32 1, %s1235_s23   ;;  %s1595_s21 = smov %s1231_s22 }
 0x265   : > { %p13_p5 = scmp.ge.s32.totalorder %s16_s23, 4   ;;  %s1596_s22 = smov %s1598_s24 }
 0x267   :  { %15 = sbr.rel (!%p13_p5) target bundleno = 2 (0x2), region = 77 }

</bundles_post_ra>
